<compile_context>
chip_gen: v7x
topology: tpu7x:2x2x1
jax: 0.10.0
libtpu: 0.0.40
codegen_flags: <defaults>
</compile_context>

<pallas_src>
import functools

import jax
import jax.numpy as jnp
import numpy as np
from jax import lax
from jax.experimental import pallas as pl
from jax.experimental.pallas import tpu as pltpu


def _round_up(x, m):
    return (x + m - 1) // m * m


def _rbf_kernel(x_ref, c_ref, o_ref, *, gamma, chunk, exp_dtype):
    # x_ref: (1, tile_n) f32 (lane-dense), c_ref: (C_pad, 1) f32, o_ref: (tile_n, C).
    neg_gamma = jnp.float32(-gamma)
    c = c_ref[...]                                   # (C_pad, 1), resident across grid
    n_out = o_ref.shape[1]                           # true number of centers (<= C_pad)
    n_chunks = x_ref.shape[1] // chunk               # static Python int

    def body(j, carry):
        off = pl.multiple_of(j * chunk, chunk)       # chunk is a multiple of 128
        x = x_ref[:, pl.ds(off, chunk)]              # (1, chunk), lane-dense
        d = x - c                                    # (C_pad, chunk)      VPU
        arg = neg_gamma * (d * d)                    # (C_pad, chunk)      VPU
        y = jnp.exp(arg.astype(exp_dtype)).astype(jnp.float32)   # EUP, full lanes
        yt = jnp.transpose(y)                        # (chunk, C_pad)      XLU (idle slot)
        o_ref[pl.ds(off, chunk), :] = yt[:, :n_out].astype(o_ref.dtype)
        return carry

    lax.fori_loop(0, n_chunks, body, 0)


def rbf_pallas(x, centers, gamma, *, tile_n=16384, chunk_n=2048,
               out_dtype=jnp.float32, exp_dtype=jnp.float32):
    """x: any shape (flattened to N), centers: (C,), gamma: python float.

    Returns: (N, C) array exp(-gamma * (x - centers)^2) in `out_dtype`.
    """
    x_row = jnp.asarray(x, jnp.float32).reshape(1, -1)      # (1, N) lane-dense
    n = x_row.shape[1]

    centers_f32 = jnp.asarray(centers, jnp.float32).reshape(-1)
    n_centers = int(centers_f32.shape[0])
    # Pad centers to a sublane multiple (8) so the in-kernel XLU transpose sees an
    # aligned (C_pad, chunk) source; padded columns are sliced away before the store.
    c_pad = _round_up(max(n_centers, 1), 8)
    c_col = jnp.zeros((c_pad, 1), jnp.float32).at[:n_centers, 0].set(centers_f32)

    lane = 128
    # In-kernel chunk (lane-dense compute + transpose granularity), multiple of 128,
    # clamped for tiny inputs.
    chunk_n = lane * max(1, min(int(chunk_n) // lane, pl.cdiv(n, lane)))
    # Grid tile: multiple of chunk_n; big enough to amortize the ~0.35us/step grid
    # overhead, small enough that the lane-padded (tile_n, 128) out block stays
    # VMEM-friendly on all of v5e/v6e/v7x.
    tile_chunks = max(1, min(int(tile_n) // chunk_n, pl.cdiv(n, chunk_n)))
    # v7x megacore: prefer >= 2 grid steps when there is enough work so the
    # "parallel" N axis can be sharded across both TensorCores.
    if pl.cdiv(n, chunk_n * tile_chunks) < 2 and pl.cdiv(n, chunk_n) >= 2:
        tile_chunks = pl.cdiv(pl.cdiv(n, chunk_n), 2)
    tile_n = chunk_n * tile_chunks
    grid = (pl.cdiv(n, tile_n),)

    out_bytes = jnp.dtype(out_dtype).itemsize
    # Actual VMEM footprint (the out block is lane-padded to 128) + headroom.
    vmem_bytes = (
        2 * tile_n * _round_up(n_centers, lane) * out_bytes   # double-buffered out block
        + 2 * 8 * tile_n * 4                                  # double-buffered x row block
        + 2 * c_pad * lane * 4                                # resident centers block
        + 4 * c_pad * chunk_n * 4                             # d / arg / y temporaries
        + 2 * chunk_n * lane * 4                              # transposed-chunk staging
    )
    vmem_limit = int(min(_round_up(vmem_bytes + (4 << 20), 1 << 20), 48 << 20))

    cost = pl.CostEstimate(
        flops=3 * n_centers * n,
        transcendentals=n_centers * n,
        bytes_accessed=4 * n + 4 * n_centers + out_bytes * n_centers * n,
    )

    kernel = functools.partial(
        _rbf_kernel, gamma=float(gamma), chunk=chunk_n, exp_dtype=exp_dtype
    )

    out = pl.pallas_call(
        kernel,
        out_shape=jax.ShapeDtypeStruct((n, n_centers), out_dtype),
        grid_spec=pltpu.PrefetchScalarGridSpec(
            num_scalar_prefetch=0,
            grid=grid,
            in_specs=[
                pl.BlockSpec((1, tile_n), lambda i: (0, i)),     # x row, lane-dense
                pl.BlockSpec((c_pad, 1), lambda i: (0, 0)),      # centers, resident
            ],
            out_specs=pl.BlockSpec((tile_n, n_centers), lambda i: (i, 0)),
        ),
        compiler_params=pltpu.CompilerParams(
            dimension_semantics=("parallel",),
            vmem_limit_bytes=vmem_limit,
        ),
        cost_estimate=cost,
    )(x_row, c_col)
    return out


if __name__ == "__main__":
    # Typical RBF setup: centers = np.arange(0, 2, 0.1) -> 20 centers, gamma = 10.0
    centers = np.arange(0.0, 2.0, 0.1).astype(np.float32)    # (20,)
    gamma = 10.0

    key0, key1, key2 = jax.random.split(jax.random.PRNGKey(0), 3)

    def ref_rbf(x):
        return jnp.exp(-gamma * jnp.square(x.reshape(-1, 1) - centers.reshape(1, -1)))

    # Small input (arbitrary shape, flattened): N = 128.
    x = jax.random.uniform(key0, (2, 64), dtype=jnp.float32, minval=0.0, maxval=2.0)
    y = jax.block_until_ready(rbf_pallas(x, centers, gamma))
    assert y.shape == (128, 20), y.shape
    assert jnp.allclose(y, ref_rbf(x), atol=1e-5, rtol=1e-5)

    # Ragged N (not a multiple of 128): Pallas pads the read block / clips the write.
    x2 = jax.random.uniform(key1, (3, 33), dtype=jnp.float32, minval=0.0, maxval=2.0)
    y2 = jax.block_until_ready(rbf_pallas(x2, centers, gamma))
    assert y2.shape == (99, 20), y2.shape
    assert jnp.allclose(y2, ref_rbf(x2), atol=1e-5, rtol=1e-5)

    # Moderate N: exercises grid >= 2 steps, the in-kernel chunk loop, and a ragged
    # final block on the sublane (row) axis of the output.
    x3 = jax.random.uniform(key2, (5000,), dtype=jnp.float32, minval=0.0, maxval=2.0)
    y3 = jax.block_until_ready(rbf_pallas(x3, centers, gamma))
    assert y3.shape == (5000, 20), y3.shape
    assert jnp.allclose(y3, ref_rbf(x3), atol=1e-5, rtol=1e-5)

    print("KERNEL_OK")
</pallas_src>

<mosaic_0001>
module attributes {stable_mosaic.version = 11 : i64} {
  func.func @_rbf_kernel(%arg0: i32, %arg1: memref<1x128xf32, #tpu.memory_space<vmem>>, %arg2: memref<24x1xf32, #tpu.memory_space<vmem>>, %arg3: memref<128x20xf32, #tpu.memory_space<vmem>>) attributes {dimension_semantics = [#tpu.dimension_semantics<parallel>], iteration_bounds = array<i64: 1>, scalar_prefetch = 0 : i64, scratch_operands = 0 : i64, tpu.core_type = #tpu.core_type<tc>, window_params = [{transform_indices = @transform_0, window_bounds = array<i64: 1, 128>}, {pipeline_mode = #tpu.pipeline_mode<synchronous>, transform_indices = @transform_1, window_bounds = array<i64: 24, 1>}, {transform_indices = @transform_2, window_bounds = array<i64: 128, 20>}]} {
    %c0 = arith.constant 0 : index
    %c0_0 = arith.constant 0 : index
    %0 = vector.load %arg2[%c0, %c0_0] : memref<24x1xf32, #tpu.memory_space<vmem>>, vector<24x1xf32>
    %cst = arith.constant -1.000000e+01 : f32
    %c0_i32 = arith.constant 0 : i32
    %c128_i32 = arith.constant 128 : i32
    %1 = arith.muli %c0_i32, %c128_i32 : i32
    %2 = tpu.assume_multiple %1, 128 : i32
    %c0_1 = arith.constant 0 : index
    %3 = arith.index_cast %2 : i32 to index
    %4 = vector.load %arg1[%c0_1, %3] : memref<1x128xf32, #tpu.memory_space<vmem>>, vector<1x128xf32>
    %5 = vector.broadcast %4 : vector<1x128xf32> to vector<24x128xf32>
    %6 = vector.broadcast %0 : vector<24x1xf32> to vector<24x128xf32>
    %7 = arith.subf %5, %6 : vector<24x128xf32>
    %8 = arith.mulf %7, %7 : vector<24x128xf32>
    %9 = vector.broadcast %cst : f32 to vector<24x128xf32>
    %10 = arith.mulf %9, %8 : vector<24x128xf32>
    %11 = math.exp %10 : vector<24x128xf32>
    %12 = tpu.transpose %11, [1, 0] : vector<24x128xf32> -> vector<128x24xf32>
    %13 = vector.extract_strided_slice %12 {offsets = [0, 0], sizes = [128, 20], strides = [1, 1]} : vector<128x24xf32> to vector<128x20xf32>
    %14 = arith.index_cast %2 : i32 to index
    %c0_2 = arith.constant 0 : index
    %15 = vector.load %arg3[%14, %c0_2] : memref<128x20xf32, #tpu.memory_space<vmem>>, vector<128x20xf32>
    tpu.vector_store %arg3[%14, %c0_2], %13 {strides = array<i32>} : memref<128x20xf32, #tpu.memory_space<vmem>>, vector<128x20xf32>,
    %c1_i32 = arith.constant 1 : i32
    return
  }
  func.func @transform_0(%arg0: i32) -> (i32, i32) {
    %c0_i32 = arith.constant 0 : i32
    %c0_i32_0 = arith.constant 0 : i32
    return %c0_i32, %arg0 : i32, i32
  }
  func.func @transform_1(%arg0: i32) -> (i32, i32) {
    %c0_i32 = arith.constant 0 : i32
    %c0_i32_0 = arith.constant 0 : i32
    %c0_i32_1 = arith.constant 0 : i32
    return %c0_i32, %c0_i32_0 : i32, i32
  }
  func.func @transform_2(%arg0: i32) -> (i32, i32) {
    %c0_i32 = arith.constant 0 : i32
    %c0_i32_0 = arith.constant 0 : i32
    return %arg0, %c0_i32 : i32, i32
  }
}

</mosaic_0001>

<bundles_post_ra>
// kernel: tpu_custom_call.1
= control target key start
LH: loop header
LB: loop body
LE: loop exit
PB: predicated region body
PF: predicated region fallthrough
CT: control target
= control target key end

     0   :  { %v115_v0 = vmov 0   ;;  %vm83_vm0 = vcmask 162816   ;;  %s207_s1 = inlined_call_operand.vmem [shape: f32[24,1], index: 1, kind: input, shape index: {}]   ;;  %s208_s0 = inlined_call_operand.vmem [shape: f32[1,128], index: 0, kind: input, shape index: {}]   ;;  %s209_s2 = inlined_call_operand.vmem [shape: f32[128,20], index: 2, kind: output, shape index: {}]  }
   0x1   :  { %107 = vset.pattern.permute.xlu0 %v115_v0  ;;  %v11_v1 = vld [vmem:[%s207_s1] sm:$0xff]  ;;  %108 = vset.pattern.permute.xlu1 %v115_v0  ;;  %v13_v2 = vld [vmem:[%s207_s1 + $0x10] sm:$0xff]  ;;  %v12_v3 = vld [vmem:[%s207_s1 + $0x8] sm:$0xff] }
   0x2   :  { %23 = vperm.xlu0 %107, %v11_v1   ;;  %33 = vperm.xlu1 %108, %v13_v2   ;;  %v104_v4 = vld [vmem:[%s208_s0] ss:$0 sm:$0xff] }
   0x6   :  { %28 = vperm.xlu0 %107, %v12_v3  }
  0x81   :  { %v24_v5 = vpop.permute.xlu0 %23  ;;  %v34_v6 = vpop.permute.xlu1 %33 }
  0x82   :  { %v36_v7 = vsub.f32 %v104_v4, %v24_v5  ;;  %v38_v8 = vsub.f32 %v104_v4, %v34_v6 }
  0x84   :  { %v39_v9 = vmul.f32 %v36_v7, %v36_v7  ;;  %v41_v10 = vmul.f32 %v38_v8, %v38_v8 }
  0x85   :  { %v29_v11 = vpop.permute.xlu0 %28 }
  0x86   :  { %v42_v12 = vmul.f32 -10.0, %v39_v9  ;;  %v37_v13 = vsub.f32 %v104_v4, %v29_v11  ;;  %v44_v16 = vmul.f32 -10.0, %v41_v10 }
  0x88   :  { %v45_v14 = vmul.f32 1.442695, %v42_v12  ;;  %v40_v15 = vmul.f32 %v37_v13, %v37_v13  ;;  %v49_v19 = vmul.f32 1.442695, %v44_v16 }
  0x8a   :  { %109 = vpow2.f32 %v45_v14  ;;  %v43_v17 = vmul.f32 -10.0, %v40_v15 }
  0x8c   :  { %v47_v18 = vmul.f32 1.442695, %v43_v17 }
  0x8e   :  { %111 = vpow2.f32 %v47_v18 }
  0x8f   :  { %113 = vpow2.f32 %v49_v19 }
  0x94   :  { %v110_v20 = vpop.eup %109 }
  0x95   :  { %51 = vxpose.xlu1.b32.start [1/3] (short) %v110_v20, 128 }
  0x98   :  { %v112_v21 = vpop.eup %111 }
  0x99   :  { %52 = vxpose.xlu1.b32.cont [2/3] (short) %v112_v21, 128  ;;  %v114_v22 = vpop.eup %113 }
  0x9d   :  { %53 = vxpose.xlu1.b32.end [3/3] (short) %v114_v22, 128 }
 0x115   :  { %v67_v23 = vpop.trf.xlu1 }
 0x116   :  { %84 = vst.msk [vmem:[%s209_s2] sm:$0xff] %vm83_vm0, %v67_v23 }
 0x119   :  { %v68_v24 = vpop.trf.xlu1 }
 0x11a   :  { %85 = vst.msk [vmem:[%s209_s2 + $0x8] sm:$0xff] %vm83_vm0, %v68_v24 }
 0x11d   :  { %v69_v25 = vpop.trf.xlu1 }
 0x11e   :  { %86 = vst.msk [vmem:[%s209_s2 + $0x10] sm:$0xff] %vm83_vm0, %v69_v25 }
 0x121   :  { %v70_v26 = vpop.trf.xlu1 }
 0x122   :  { %87 = vst.msk [vmem:[%s209_s2 + $0x18] sm:$0xff] %vm83_vm0, %v70_v26 }
 0x125   :  { %v71_v27 = vpop.trf.xlu1 }
 0x126   :  { %88 = vst.msk [vmem:[%s209_s2 + $0x20] sm:$0xff] %vm83_vm0, %v71_v27 }
 0x129   :  { %v72_v28 = vpop.trf.xlu1 }
 0x12a   :  { %89 = vst.msk [vmem:[%s209_s2 + $0x28] sm:$0xff] %vm83_vm0, %v72_v28 }
 0x12d   :  { %v73_v29 = vpop.trf.xlu1 }
 0x12e   :  { %90 = vst.msk [vmem:[%s209_s2 + $0x30] sm:$0xff] %vm83_vm0, %v73_v29 }
 0x131   :  { %v74_v30 = vpop.trf.xlu1 }
 0x132   :  { %91 = vst.msk [vmem:[%s209_s2 + $0x38] sm:$0xff] %vm83_vm0, %v74_v30 }
 0x135   :  { %v75_v31 = vpop.trf.xlu1 }
 0x136   :  { %92 = vst.msk [vmem:[%s209_s2 + $0x40] sm:$0xff] %vm83_vm0, %v75_v31 }
 0x139   :  { %v76_v32 = vpop.trf.xlu1 }
 0x13a   :  { %93 = vst.msk [vmem:[%s209_s2 + $0x48] sm:$0xff] %vm83_vm0, %v76_v32 }
 0x13d   :  { %v77_v33 = vpop.trf.xlu1 }
 0x13e   :  { %94 = vst.msk [vmem:[%s209_s2 + $0x50] sm:$0xff] %vm83_vm0, %v77_v33 }
 0x141   :  { %v78_v34 = vpop.trf.xlu1 }
 0x142   :  { %95 = vst.msk [vmem:[%s209_s2 + $0x58] sm:$0xff] %vm83_vm0, %v78_v34 }
 0x145   :  { %v79_v35 = vpop.trf.xlu1 }
 0x146   :  { %96 = vst.msk [vmem:[%s209_s2 + $0x60] sm:$0xff] %vm83_vm0, %v79_v35 }
 0x149   :  { %v80_v36 = vpop.trf.xlu1 }
 0x14a   :  { %97 = vst.msk [vmem:[%s209_s2 + $0x68] sm:$0xff] %vm83_vm0, %v80_v36 }
 0x14d   :  { %v81_v37 = vpop.trf.xlu1 }
 0x14e   :  { %98 = vst.msk [vmem:[%s209_s2 + $0x70] sm:$0xff] %vm83_vm0, %v81_v37 }
 0x151   :  { %v82_v38 = vpop.trf.xlu1 }
 0x152   :  { %99 = vst.msk [vmem:[%s209_s2 + $0x78] sm:$0xff] %vm83_vm0, %v82_v38 }

</bundles_post_ra>
